<compile_context>
chip_gen: v5e
topology: v5e:2x2
jax: 0.10.0
libtpu: 0.0.40
codegen_flags: <defaults>
</compile_context>

<pallas_src>
import jax
import jax.numpy as jnp
from jax.experimental import pallas as pl
from jax.experimental.pallas import tpu as pltpu


def _identity_kernel(x_ref, o_ref):
    # Hot path: straight VMEM tile copy (identity forward).
    o_ref[...] = x_ref[...]


def dummy_module_forward(x):
    """Identity forward of DummyModule, run through a Pallas TPU copy kernel."""
    orig_shape = x.shape
    orig_dtype = x.dtype
    n = int(x.size)

    if n == 0:
        # Degenerate empty tensor: nothing to copy.
        return x

    lane = 128
    itemsize = jnp.dtype(orig_dtype).itemsize
    # Sublane packing alignment: f32 -> 8, bf16 -> 16, int8/fp8 -> 32.
    sub = max(8, 32 // max(itemsize, 1))

    # Pick the widest lane-dense column count (multiple of 128) dividing n.
    ncols = 0
    for cand in (32768, 16384, 8192, 4096, 2048, 1024, 512, 256, 128):
        if n % cand == 0:
            ncols = cand
            break

    if ncols == 0:
        # Rare fallback: n not a multiple of 128 — pad only the tail (one op).
        ncols = lane
        pad = (-n) % ncols
        flat = jnp.pad(x.reshape(-1), (0, pad))
        padded = True
    else:
        flat = x.reshape(-1)
        padded = False

    nrows = flat.shape[0] // ncols
    x2d = flat.reshape(nrows, ncols)

    # Tile sizing: biggest lane-dense tile that keeps the double-buffered
    # footprint (4 * tile) comfortably inside the scoped-VMEM budget below.
    max_tile_bytes = 4 * 1024 * 1024  # 4 MiB/tile -> ~16 MiB pipelined footprint
    bytes_per_row = ncols * itemsize
    tile_rows = min(nrows, max(sub, max_tile_bytes // bytes_per_row))
    if tile_rows < nrows:
        # Keep sublane alignment; ragged last block handled by the cdiv grid.
        tile_rows = max(sub, (tile_rows // sub) * sub)
    tile_rows = max(1, tile_rows)

    grid = (pl.cdiv(nrows, tile_rows),)

    out2d = pl.pallas_call(
        _identity_kernel,
        out_shape=jax.ShapeDtypeStruct((nrows, ncols), orig_dtype),
        grid_spec=pltpu.PrefetchScalarGridSpec(
            num_scalar_prefetch=0,
            grid=grid,
            in_specs=[pl.BlockSpec((tile_rows, ncols), lambda i: (i, 0))],
            out_specs=pl.BlockSpec((tile_rows, ncols), lambda i: (i, 0)),
        ),
        # Identity: output is bit-identical to the input; let XLA reuse buffer.
        input_output_aliases={0: 0},
        compiler_params=pltpu.CompilerParams(
            dimension_semantics=("parallel",),  # shards rows across v7x's 2 TCs
            vmem_limit_bytes=32 * 1024 * 1024,  # safe on v5e/v6e/v7x
        ),
    )(x2d)

    out_flat = out2d.reshape(-1)
    if padded:
        out_flat = out_flat[:n]
    return out_flat.reshape(orig_shape)


if __name__ == "__main__":
    key = jax.random.PRNGKey(0)
    # DummyModule has no parameters; forward accepts any tensor.
    x = jax.random.normal(key, (2, 4, 16, 16), dtype=jnp.float32)

    y = dummy_module_forward(x)
    y = jax.block_until_ready(y)

    assert y.shape == x.shape
    assert y.dtype == x.dtype
    assert jnp.array_equal(y, x)

    print("KERNEL_OK")
</pallas_src>

<mosaic_0001>
module attributes {stable_mosaic.version = 11 : i64} {
  func.func @_identity_kernel(%arg0: i32, %arg1: memref<1x2048xf32, #tpu.memory_space<vmem>>, %arg2: memref<1x2048xf32, #tpu.memory_space<vmem>>) attributes {dimension_semantics = [#tpu.dimension_semantics<parallel>], iteration_bounds = array<i64: 1>, scalar_prefetch = 0 : i64, scratch_operands = 0 : i64, tpu.core_type = #tpu.core_type<tc>, window_params = [{transform_indices = @transform_0, window_bounds = array<i64: 1, 2048>}, {transform_indices = @transform_1, window_bounds = array<i64: 1, 2048>}]} {
    %c0 = arith.constant 0 : index
    %c0_0 = arith.constant 0 : index
    %0 = vector.load %arg1[%c0, %c0_0] : memref<1x2048xf32, #tpu.memory_space<vmem>>, vector<1x2048xf32>
    %c0_1 = arith.constant 0 : index
    %c0_2 = arith.constant 0 : index
    %1 = vector.load %arg2[%c0_1, %c0_2] : memref<1x2048xf32, #tpu.memory_space<vmem>>, vector<1x2048xf32>
    tpu.vector_store %arg2[%c0_1, %c0_2], %0 {strides = array<i32>} : memref<1x2048xf32, #tpu.memory_space<vmem>>, vector<1x2048xf32>,
    return
  }
  func.func @transform_0(%arg0: i32) -> (i32, i32) {
    %c0_i32 = arith.constant 0 : i32
    %c0_i32_0 = arith.constant 0 : i32
    return %arg0, %c0_i32 : i32, i32
  }
  func.func @transform_1(%arg0: i32) -> (i32, i32) {
    %c0_i32 = arith.constant 0 : i32
    %c0_i32_0 = arith.constant 0 : i32
    return %arg0, %c0_i32 : i32, i32
  }
}

</mosaic_0001>

<bundles_post_ra>
// kernel: tpu_custom_call.1
= control target key start
LH: loop header
LB: loop body
LE: loop exit
PB: predicated region body
PF: predicated region fallthrough
CT: control target
= control target key end

     0   :  { %6 = vsyncpa [#allocation3], 0  ;;  %s116_s0 = inlined_call_operand.hbm [shape: f32[1,2048], index: 0, kind: input, shape index: {}, may-alias: {0,1}]   ;;  %s117_s1 = inlined_call_operand.hbm [shape: f32[1,2048], index: 1, kind: output, shape index: {}, may-alias: {0,1}]  }
   0x1   :  { %7 = vsyncpa [#allocation4], 0  ;;  %s13_s8 = sshll.u32 %s116_s0, 4  ;;  %s98_s9 = smov [#allocation2]   ;;  %s14_s8 = int_to_ptr.hbm [resolvable:$true] %s13_s8 }
   0x2   :  { %s15_s10 = sshll.u32 %s98_s9, 4  ;;  %s16_s10 = int_to_ptr.vmem [resolvable:$true] %s15_s10 }
   0x3   :  { %18 = dma.hbm_to_vmem [thread:$0]  %s14_s8, 256, %s16_s10, [#allocation3]  }
   0x4   :  { %94 = dma.done.wait [#allocation3], 256  }
   0x5   :  { %95 = vsyncadd [#allocation3], 4294967040  ;;  %s99_s11 = smov [#allocation5]   ;;  %s34_s15 = sshll.u32 %s117_s1, 4  ;;  %v23_v0 = vld [vmem:[#allocation2] sm:$0xff]  ;;  %v24_v1 = vld [vmem:[#allocation2 + $0x8] sm:$0xff]  ;;  %s35_s15 = int_to_ptr.hbm [resolvable:$true] %s34_s15 }
   0x6   :  { %s32_s12 = sshll.u32 %s99_s11, 4  ;;  %25 = vst [vmem:[#allocation5] sm:$0xff] %v23_v0  ;;  %s33_s12 = int_to_ptr.vmem [resolvable:$true] %s32_s12 }
   0x7   :  { %26 = vst [vmem:[#allocation5 + $0x8] sm:$0xff] %v24_v1 }
   0x8   :  { %37 = dma.vmem_to_hbm [thread:$0]  %s33_s12, 256, %s35_s15, [#allocation4]  }
   0x9   :  { %96 = dma.done.wait [#allocation4], 256  }
   0xa   :  { %97 = vsyncadd [#allocation4], 4294967040 }
   0xb   :  { %42 = vsyncpa [#allocation3], 1 }
   0xc   :  { %43 = vsyncpa [#allocation4], 1 }

</bundles_post_ra>
